<compile_context>
chip_gen: v5e
topology: v5e:2x2
jax: 0.10.0
libtpu: 0.0.40
codegen_flags: <defaults>
</compile_context>

<pallas_src>
import jax
import jax.numpy as jnp
from jax.experimental import pallas as pl
from jax.experimental.pallas import tpu as pltpu

NUM_CLASSES = 10
C_PAD = 128            # lane-dense classifier width (10 -> 128)
BN_EPS = 1e-5
NEG_INF = -1e30        # bias for padded logit columns -> exp() underflows to 0


def pointnet_kernel(x_ref, w1_ref, b1_ref, w2_ref, b2_ref, w3_ref, b3_ref,
                    out_ref):
    """Forward pass for one (TILE_N, 256) row tile, entirely in VMEM."""
    x = x_ref[...]                                                     # (T,256) bf16

    # fc_1 (+ folded bn_1) + relu
    h = jnp.dot(x, w1_ref[...], preferred_element_type=jnp.float32)   # (T,128) f32
    h = jnp.maximum(h + b1_ref[...], 0.0).astype(jnp.bfloat16)

    # fc_2 (+ folded bn_2) + relu
    h = jnp.dot(h, w2_ref[...], preferred_element_type=jnp.float32)   # (T,64) f32
    h = jnp.maximum(h + b2_ref[...], 0.0).astype(jnp.bfloat16)

    # dropout_1: identity in inference mode
    # TODO(synk): training-mode dropout (random mask) not implemented.

    # fc_3 (padded to 128 lanes) + numerically stable log_softmax
    logits = jnp.dot(h, w3_ref[...], preferred_element_type=jnp.float32)
    logits = logits + b3_ref[...]                                      # (T,128) f32
    m = jnp.max(logits, axis=1, keepdims=True)
    z = logits - m
    lse = jnp.log(jnp.sum(jnp.exp(z), axis=1, keepdims=True))
    out_ref[...] = z - lse


def _round_up(x, m):
    return (x + m - 1) // m * m


def prepare_params(params):
    """Fold BN into the linears, pad the classifier head to 128 lanes and cast
    matmul operands to bf16.  Pure wrapper-side constant folding."""
    (w1, b1, s1, t1, w2, b2, s2, t2, w3, b3) = params
    w1f = (w1 * s1).astype(jnp.bfloat16)                 # (256,128)
    b1f = (b1 * s1 + t1).astype(jnp.float32)             # (1,128)
    w2f = (w2 * s2).astype(jnp.bfloat16)                 # (128,64)
    b2f = (b2 * s2 + t2).astype(jnp.float32)             # (1,64)
    w3p = jnp.zeros((w3.shape[0], C_PAD), jnp.float32).at[:, :NUM_CLASSES].set(w3)
    b3p = jnp.full((1, C_PAD), NEG_INF, jnp.float32).at[:, :NUM_CLASSES].set(b3)
    return (w1f, b1f, w2f, b2f, w3p.astype(jnp.bfloat16), b3p.astype(jnp.float32))


def classification_pointnet(x, folded_params, tile_n=512):
    """x: (N, 256) float. Returns (N, NUM_CLASSES) float32 log-probabilities."""
    n = x.shape[0]
    (w1, b1, w2, b2, w3, b3) = folded_params

    # Row tile: multiple of 16 (bf16 sublane packing); shrink for tiny batches.
    tile_n = min(tile_n, max(16, _round_up(n, 16)))
    n_pad = _round_up(n, tile_n)
    x = x.astype(jnp.bfloat16)
    if n_pad != n:
        x = jnp.pad(x, ((0, n_pad - n), (0, 0)))
    num_tiles = n_pad // tile_n

    const = lambda i: (0, 0)   # weights/biases: same block every grid step

    flops = 2 * n_pad * (256 * 128 + 128 * 64 + 64 * C_PAD)
    bytes_accessed = (x.size * 2 + n_pad * C_PAD * 4
                      + (w1.size + w2.size + w3.size) * 2
                      + (b1.size + b2.size + b3.size) * 4)
    # Explicit VMEM budget from tile math (x tile + out tile, double-buffered,
    # plus weights/intermediates headroom).  Safe for v7x's 64 MiB VMEM.
    vmem_bytes = min(64 * 1024 * 1024,
                     max(4 * 1024 * 1024,
                         4 * (tile_n * 256 * 2 + tile_n * C_PAD * 4)
                         + 2 * 1024 * 1024))

    out = pl.pallas_call(
        pointnet_kernel,
        out_shape=jax.ShapeDtypeStruct((n_pad, C_PAD), jnp.float32),
        grid=(num_tiles,),
        in_specs=[
            pl.BlockSpec((tile_n, 256), lambda i: (i, 0)),   # x: streamed row tiles
            pl.BlockSpec((256, 128), const),                 # w1'
            pl.BlockSpec((1, 128), const),                   # b1'
            pl.BlockSpec((128, 64), const),                  # w2'
            pl.BlockSpec((1, 64), const),                    # b2'
            pl.BlockSpec((64, C_PAD), const),                # w3 (padded)
            pl.BlockSpec((1, C_PAD), const),                 # b3 (padded)
        ],
        out_specs=pl.BlockSpec((tile_n, C_PAD), lambda i: (i, 0)),
        compiler_params=pltpu.CompilerParams(
            dimension_semantics=("parallel",),
            vmem_limit_bytes=int(vmem_bytes)),
        cost_estimate=pl.CostEstimate(
            flops=flops,
            transcendentals=n_pad * (C_PAD + 1),
            bytes_accessed=int(bytes_accessed)),
    )(x, w1, b1, w2, b2, w3, b3)

    return out[:n, :NUM_CLASSES]


def make_params(key):
    """Deterministic parameter init matching the PyTorch module's shapes."""
    ks = jax.random.split(key, 14)

    def lin(kw, kb, fan_in, fan_out):
        bound = 1.0 / jnp.sqrt(fan_in)
        w = jax.random.uniform(kw, (fan_in, fan_out), jnp.float32, -bound, bound)
        b = jax.random.uniform(kb, (1, fan_out), jnp.float32, -bound, bound)
        return w, b

    w1, b1 = lin(ks[0], ks[1], 256, 128)
    w2, b2 = lin(ks[2], ks[3], 128, 64)
    w3, b3 = lin(ks[4], ks[5], 64, NUM_CLASSES)

    def bn(kg, kb, km, kv, c):
        gamma = 1.0 + 0.1 * jax.random.normal(kg, (1, c), jnp.float32)
        beta = 0.1 * jax.random.normal(kb, (1, c), jnp.float32)
        rmean = 0.1 * jax.random.normal(km, (1, c), jnp.float32)
        rvar = 1.0 + 0.1 * jax.random.uniform(kv, (1, c), jnp.float32)
        scale = gamma / jnp.sqrt(rvar + BN_EPS)   # fold running-stat BN
        shift = beta - rmean * scale
        return scale, shift

    s1, t1 = bn(ks[6], ks[7], ks[8], ks[9], 128)
    s2, t2 = bn(ks[10], ks[11], ks[12], ks[13], 64)

    return (w1, b1, s1, t1, w2, b2, s2, t2, w3, b3)


def reference_forward(x, folded_params):
    """Pure-JAX reference with the same folded params / bf16 matmul operands."""
    (w1, b1, w2, b2, w3, b3) = folded_params
    xb = x.astype(jnp.bfloat16)
    h = jnp.maximum(jnp.dot(xb, w1, preferred_element_type=jnp.float32) + b1, 0.0)
    h = jnp.maximum(
        jnp.dot(h.astype(jnp.bfloat16), w2, preferred_element_type=jnp.float32) + b2, 0.0)
    logits = jnp.dot(h.astype(jnp.bfloat16), w3,
                     preferred_element_type=jnp.float32) + b3
    return jax.nn.log_softmax(logits[:, :NUM_CLASSES], axis=1)


if __name__ == "__main__":
    key = jax.random.PRNGKey(0)
    k_x, k_p = jax.random.split(key)

    N = 8                                  # small batch of 256-d point features
    x = jax.random.normal(k_x, (N, 256), jnp.float32)
    params = make_params(k_p)
    folded = prepare_params(params)

    out = classification_pointnet(x, folded)
    out = jax.block_until_ready(out)

    ref = reference_forward(x, folded)
    assert out.shape == (N, NUM_CLASSES)
    assert jnp.allclose(out, ref, atol=2e-2, rtol=2e-2), "mismatch vs JAX reference"
    # log_softmax rows should sum (in prob space) to ~1
    assert jnp.allclose(jnp.sum(jnp.exp(out), axis=1), 1.0, atol=1e-3)

    print("KERNEL_OK")
</pallas_src>

<mosaic_0001>
module attributes {stable_mosaic.version = 11 : i64} {
  func.func @pointnet_kernel(%arg0: i32, %arg1: memref<16x256xbf16, #tpu.memory_space<vmem>>, %arg2: memref<256x128xbf16, #tpu.memory_space<vmem>>, %arg3: memref<1x128xf32, #tpu.memory_space<vmem>>, %arg4: memref<128x64xbf16, #tpu.memory_space<vmem>>, %arg5: memref<1x64xf32, #tpu.memory_space<vmem>>, %arg6: memref<64x128xbf16, #tpu.memory_space<vmem>>, %arg7: memref<1x128xf32, #tpu.memory_space<vmem>>, %arg8: memref<16x128xf32, #tpu.memory_space<vmem>>) attributes {dimension_semantics = [#tpu.dimension_semantics<parallel>], iteration_bounds = array<i64: 1>, scalar_prefetch = 0 : i64, scratch_operands = 0 : i64, tpu.core_type = #tpu.core_type<tc>, window_params = [{transform_indices = @transform_0, window_bounds = array<i64: 16, 256>}, {pipeline_mode = #tpu.pipeline_mode<synchronous>, transform_indices = @transform_1, window_bounds = array<i64: 256, 128>}, {pipeline_mode = #tpu.pipeline_mode<synchronous>, transform_indices = @transform_2, window_bounds = array<i64: 1, 128>}, {pipeline_mode = #tpu.pipeline_mode<synchronous>, transform_indices = @transform_3, window_bounds = array<i64: 128, 64>}, {pipeline_mode = #tpu.pipeline_mode<synchronous>, transform_indices = @transform_4, window_bounds = array<i64: 1, 64>}, {pipeline_mode = #tpu.pipeline_mode<synchronous>, transform_indices = @transform_5, window_bounds = array<i64: 64, 128>}, {pipeline_mode = #tpu.pipeline_mode<synchronous>, transform_indices = @transform_6, window_bounds = array<i64: 1, 128>}, {transform_indices = @transform_7, window_bounds = array<i64: 16, 128>}]} {
    %c0 = arith.constant 0 : index
    %c0_0 = arith.constant 0 : index
    %0 = vector.load %arg1[%c0, %c0_0] : memref<16x256xbf16, #tpu.memory_space<vmem>>, vector<16x256xbf16>
    %c0_1 = arith.constant 0 : index
    %c0_2 = arith.constant 0 : index
    %1 = vector.load %arg2[%c0_1, %c0_2] : memref<256x128xbf16, #tpu.memory_space<vmem>>, vector<256x128xbf16>
    %cst = arith.constant dense<0.000000e+00> : vector<16x128xf32>
    %2 = tpu.matmul %0, %1, %cst {dimension_numbers = #tpu.dot_dimension_numbers<[1], [0], [0], [1], [0, 0, 1, 1], [], []>} : vector<16x256xbf16>, vector<256x128xbf16>, vector<16x128xf32> -> vector<16x128xf32>
    %c0_3 = arith.constant 0 : index
    %c0_4 = arith.constant 0 : index
    %3 = vector.load %arg3[%c0_3, %c0_4] : memref<1x128xf32, #tpu.memory_space<vmem>>, vector<1x128xf32>
    %4 = vector.broadcast %3 : vector<1x128xf32> to vector<16x128xf32>
    %5 = arith.addf %2, %4 : vector<16x128xf32>
    %cst_5 = arith.constant 0.000000e+00 : f32
    %6 = vector.broadcast %cst_5 : f32 to vector<16x128xf32>
    %7 = arith.maximumf %5, %6 : vector<16x128xf32>
    %8 = arith.truncf %7 : vector<16x128xf32> to vector<16x128xbf16>
    %c0_6 = arith.constant 0 : index
    %c0_7 = arith.constant 0 : index
    %9 = vector.load %arg4[%c0_6, %c0_7] : memref<128x64xbf16, #tpu.memory_space<vmem>>, vector<128x64xbf16>
    %cst_8 = arith.constant dense<0.000000e+00> : vector<16x64xf32>
    %10 = tpu.matmul %8, %9, %cst_8 {dimension_numbers = #tpu.dot_dimension_numbers<[1], [0], [0], [1], [0, 0, 1, 1], [], []>} : vector<16x128xbf16>, vector<128x64xbf16>, vector<16x64xf32> -> vector<16x64xf32>
    %c0_9 = arith.constant 0 : index
    %c0_10 = arith.constant 0 : index
    %11 = vector.load %arg5[%c0_9, %c0_10] : memref<1x64xf32, #tpu.memory_space<vmem>>, vector<1x64xf32>
    %12 = vector.broadcast %11 : vector<1x64xf32> to vector<16x64xf32>
    %13 = arith.addf %10, %12 : vector<16x64xf32>
    %cst_11 = arith.constant 0.000000e+00 : f32
    %14 = vector.broadcast %cst_11 : f32 to vector<16x64xf32>
    %15 = arith.maximumf %13, %14 : vector<16x64xf32>
    %16 = arith.truncf %15 : vector<16x64xf32> to vector<16x64xbf16>
    %c0_12 = arith.constant 0 : index
    %c0_13 = arith.constant 0 : index
    %17 = vector.load %arg6[%c0_12, %c0_13] : memref<64x128xbf16, #tpu.memory_space<vmem>>, vector<64x128xbf16>
    %cst_14 = arith.constant dense<0.000000e+00> : vector<16x128xf32>
    %18 = tpu.matmul %16, %17, %cst_14 {dimension_numbers = #tpu.dot_dimension_numbers<[1], [0], [0], [1], [0, 0, 1, 1], [], []>} : vector<16x64xbf16>, vector<64x128xbf16>, vector<16x128xf32> -> vector<16x128xf32>
    %c0_15 = arith.constant 0 : index
    %c0_16 = arith.constant 0 : index
    %19 = vector.load %arg7[%c0_15, %c0_16] : memref<1x128xf32, #tpu.memory_space<vmem>>, vector<1x128xf32>
    %20 = vector.broadcast %19 : vector<1x128xf32> to vector<16x128xf32>
    %21 = arith.addf %18, %20 : vector<16x128xf32>
    %cst_17 = arith.constant dense<0xFF800000> : vector<16xf32>
    %22 = vector.multi_reduction <maximumf>, %21, %cst_17 [1] : vector<16x128xf32> to vector<16xf32>
    %23 = vector.shape_cast %22 : vector<16xf32> to vector<16x1xf32>
    %24 = vector.broadcast %23 : vector<16x1xf32> to vector<16x128xf32>
    %25 = arith.subf %21, %24 : vector<16x128xf32>
    %26 = math.exp %25 : vector<16x128xf32>
    %cst_18 = arith.constant dense<0.000000e+00> : vector<16xf32>
    %27 = vector.multi_reduction <add>, %26, %cst_18 [1] : vector<16x128xf32> to vector<16xf32>
    %28 = vector.shape_cast %27 : vector<16xf32> to vector<16x1xf32>
    %29 = math.log %28 : vector<16x1xf32>
    %30 = vector.broadcast %29 : vector<16x1xf32> to vector<16x128xf32>
    %31 = arith.subf %25, %30 : vector<16x128xf32>
    %c0_19 = arith.constant 0 : index
    %c0_20 = arith.constant 0 : index
    %32 = vector.load %arg8[%c0_19, %c0_20] : memref<16x128xf32, #tpu.memory_space<vmem>>, vector<16x128xf32>
    tpu.vector_store %arg8[%c0_19, %c0_20], %31 {strides = array<i32>} : memref<16x128xf32, #tpu.memory_space<vmem>>, vector<16x128xf32>,
    return
  }
  func.func @transform_0(%arg0: i32) -> (i32, i32) {
    %c0_i32 = arith.constant 0 : i32
    %c0_i32_0 = arith.constant 0 : i32
    return %arg0, %c0_i32 : i32, i32
  }
  func.func @transform_1(%arg0: i32) -> (i32, i32) {
    %c0_i32 = arith.constant 0 : i32
    %c0_i32_0 = arith.constant 0 : i32
    %c0_i32_1 = arith.constant 0 : i32
    return %c0_i32, %c0_i32_0 : i32, i32
  }
  func.func @transform_2(%arg0: i32) -> (i32, i32) {
    %c0_i32 = arith.constant 0 : i32
    %c0_i32_0 = arith.constant 0 : i32
    %c0_i32_1 = arith.constant 0 : i32
    return %c0_i32, %c0_i32_0 : i32, i32
  }
  func.func @transform_3(%arg0: i32) -> (i32, i32) {
    %c0_i32 = arith.constant 0 : i32
    %c0_i32_0 = arith.constant 0 : i32
    %c0_i32_1 = arith.constant 0 : i32
    return %c0_i32, %c0_i32_0 : i32, i32
  }
  func.func @transform_4(%arg0: i32) -> (i32, i32) {
    %c0_i32 = arith.constant 0 : i32
    %c0_i32_0 = arith.constant 0 : i32
    %c0_i32_1 = arith.constant 0 : i32
    return %c0_i32, %c0_i32_0 : i32, i32
  }
  func.func @transform_5(%arg0: i32) -> (i32, i32) {
    %c0_i32 = arith.constant 0 : i32
    %c0_i32_0 = arith.constant 0 : i32
    %c0_i32_1 = arith.constant 0 : i32
    return %c0_i32, %c0_i32_0 : i32, i32
  }
  func.func @transform_6(%arg0: i32) -> (i32, i32) {
    %c0_i32 = arith.constant 0 : i32
    %c0_i32_0 = arith.constant 0 : i32
    %c0_i32_1 = arith.constant 0 : i32
    return %c0_i32, %c0_i32_0 : i32, i32
  }
  func.func @transform_7(%arg0: i32) -> (i32, i32) {
    %c0_i32 = arith.constant 0 : i32
    %c0_i32_0 = arith.constant 0 : i32
    return %arg0, %c0_i32 : i32, i32
  }
}

</mosaic_0001>

<bundles_post_ra>
// kernel: tpu_custom_call.1
= control target key start
LH: loop header
LB: loop body
LE: loop exit
PB: predicated region body
PF: predicated region fallthrough
CT: control target
= control target key end

     0   :  { %12 = vsyncpa [#allocation3], 0  ;;  %s728_s0 = inlined_call_operand.vmem [shape: bf16[16,256], index: 0, kind: input, shape index: {}]   ;;  %s729_s1 = inlined_call_operand.hbm [shape: bf16[256,128], index: 1, kind: input, shape index: {}]   ;;  %s730_s2 = inlined_call_operand.vmem [shape: f32[1,128], index: 2, kind: input, shape index: {}]   ;;  %s731_s3 = inlined_call_operand.vmem [shape: bf16[128,64], index: 3, kind: input, shape index: {}]   ;;  %s732_s4 = inlined_call_operand.vmem [shape: f32[1,64], index: 4, kind: input, shape index: {}]   ;;  %s733_s5 = inlined_call_operand.vmem [shape: bf16[64,128], index: 5, kind: input, shape index: {}]   ;;  %s734_s6 = inlined_call_operand.vmem [shape: f32[1,128], index: 6, kind: input, shape index: {}]   ;;  %s735_s7 = inlined_call_operand.hbm [shape: f32[16,128], index: 7, kind: output, shape index: {}]  }
   0x1   :  { %13 = vsyncpa [#allocation4], 0  ;;  %s20_s26 = sshll.u32 %s729_s1, 4  ;;  %s619_s27 = smov [#allocation2]   ;;  %s21_s26 = int_to_ptr.hbm [resolvable:$true] %s20_s26 }
   0x2   :  { %s22_s28 = sshll.u32 %s619_s27, 4  ;;  %s620_s29 = smov 64   ;;  %s23_s28 = int_to_ptr.vmem [resolvable:$true] %s22_s28 }
   0x3   :  { %s621_s30 = smov 4  }
   0x4   :  { %28 = dma.hbm_to_vmem [thread:$0]  %s21_s26, 2048, %s23_s28, [#allocation3], %s620_s29, %s620_s29, %s621_s30  }
   0x5   :  { %615 = dma.done.wait [#allocation3], 2048  }
   0x6   :  { %616 = vsyncadd [#allocation3], 4294965248  ;;  %v529_v0 = vld [vmem:[#allocation2 + $0x38] sm:$0xff]  ;;  %v528_v2 = vld [vmem:[#allocation2 + $0x30] sm:$0xff]  ;;  %vm340_vm0 = vcmask 523264   ;;  %s386_s19 = sshll.u32 %s735_s7, 4  ;;  %s387_s19 = int_to_ptr.hbm [resolvable:$true] %s386_s19 }
   0x7   :  { %v537_v1 = vld [vmem:[#allocation2 + $0x78] sm:$0xff]  ;;  %188 = vmatpush.bf16.msra.mxu0 %v529_v0  ;;  %v536_v3 = vld [vmem:[#allocation2 + $0x70] sm:$0xff]  ;;  %v527_v4 = vld [vmem:[#allocation2 + $0x28] sm:$0xff]  ;;  %s623_s20 = smov 128   ;;  %s624_s21 = smov 8  }
   0x8   :  { %202 = vmatpush.bf16.msra.mxu1 %v537_v1  ;;  %v535_v5 = vld [vmem:[#allocation2 + $0x68] sm:$0xff]  ;;  %v545_v6 = vld [vmem:[%s731_s3 + $0x38] sm:$0xff]  ;;  %v544_v7 = vld [vmem:[%s731_s3 + $0x30] sm:$0xff] }
   0x9   :  { %287 = vmatpush.bf16.msra.mxu2 %v545_v6  ;;  %v526_v8 = vld [vmem:[#allocation2 + $0x20] sm:$0xff]  ;;  %v543_v10 = vld [vmem:[%s731_s3 + $0x28] sm:$0xff]  ;;  %v525_v11 = vld [vmem:[#allocation2 + $0x18] sm:$0xff] }
   0xa   :  { %v534_v9 = vld [vmem:[#allocation2 + $0x60] sm:$0xff]  ;;  %v533_v12 = vld [vmem:[#allocation2 + $0x58] sm:$0xff]  ;;  %v524_v14 = vld [vmem:[#allocation2 + $0x10] sm:$0xff] }
   0xb   :  { %189 = vmatpush.bf16.msra.mxu0 %v528_v2  ;;  %v542_v13 = vld [vmem:[%s731_s3 + $0x20] sm:$0xff]  ;;  %v532_v15 = vld [vmem:[#allocation2 + $0x50] sm:$0xff]  ;;  %v523_v16 = vld [vmem:[#allocation2 + $0x8] sm:$0xff] }
   0xc   :  { %203 = vmatpush.bf16.msra.mxu1 %v536_v3  ;;  %v531_v17 = vld [vmem:[#allocation2 + $0x48] sm:$0xff]  ;;  %v522_v18 = vld [vmem:[#allocation2] sm:$0xff]  ;;  %v541_v26 = vld [vmem:[%s731_s3 + $0x18] sm:$0xff] }
   0xd   :  { %288 = vmatpush.bf16.msra.mxu2 %v544_v7  ;;  %v530_v19 = vld [vmem:[#allocation2 + $0x40] sm:$0xff]  ;;  %v521_v21 = vld [vmem:[%s728_s0 + $0x4] sm:$0xf0]  ;;  %v403_v23 = vld [vmem:[%s728_s0 + $0x8] sm:$0xf0] }
   0xe   :  { %v401_v20 = vld [vmem:[%s728_s0] sm:$0xf]  ;;  %v520_v22 = vld [vmem:[%s728_s0 + $0x4] sm:$0xf]  ;;  %v540_v27 = vld [vmem:[%s731_s3 + $0x10] sm:$0xff] }
   0xf   :  { %190 = vmatpush.bf16.msra.mxu0 %v527_v4  ;;  %v402_v24 = vor.u32 %v521_v21, %v401_v20  ;;  %v406_v25 = vor.u32 %v520_v22, %v403_v23  ;;  %v539_v28 = vld [vmem:[%s731_s3 + $0x8] sm:$0xff]  ;;  %v538_v29 = vld [vmem:[%s731_s3] sm:$0xff]  ;;  %v549_v42 = vld [vmem:[%s733_s5 + $0x18] sm:$0xff] }
  0x10   :  { %204 = vmatpush.bf16.msra.mxu1 %v535_v5  ;;  %v556_v32 = vld [vmem:[%s730_s2] ss:$0 sm:$0xff]  ;;  %348 = vmatpush.bf16.msra.mxu3 %v549_v42  ;;  %v548_v43 = vld [vmem:[%s733_s5 + $0x10] sm:$0xff]  ;;  %v547_v44 = vld [vmem:[%s733_s5 + $0x8] sm:$0xff] }
  0x11   :  { %289 = vmatpush.bf16.msra.mxu2 %v543_v10  ;;  %v546_v45 = vld [vmem:[%s733_s5] sm:$0xff] }
  0x12   :  { %v557_v47 = vld [vmem:[%s732_s4] ss:$0 sm:$0xff]  ;;  %s622_s4 = smov [#allocation5]  }
  0x13   :  { %191 = vmatpush.bf16.msra.mxu0 %v526_v8  ;;  %v558_v54 = vld [vmem:[%s734_s6] ss:$0 sm:$0xff]  ;;  %s384_s5 = sshll.u32 %s622_s4, 4  ;;  %s385_s5 = int_to_ptr.vmem [resolvable:$true] %s384_s5 }
  0x14   :  { %205 = vmatpush.bf16.msra.mxu1 %v534_v9  ;;  %349 = vmatpush.bf16.msra.mxu3 %v548_v43 }
  0x15   :  { %290 = vmatpush.bf16.msra.mxu2 %v542_v13 }
  0x17   :  { %192 = vmatpush.bf16.msra.mxu0 %v525_v11 }
  0x18   :  { %206 = vmatpush.bf16.msra.mxu1 %v533_v12  ;;  %350 = vmatpush.bf16.msra.mxu3 %v547_v44 }
  0x19   :  { %291 = vmatpush.bf16.msra.mxu2 %v541_v26 }
  0x1b   :  { %193 = vmatpush.bf16.msra.mxu0 %v524_v14 }
  0x1c   :  { %207 = vmatpush.bf16.msra.mxu1 %v532_v15  ;;  %351 = vmatpush.bf16.msra.mxu3 %v546_v45 }
  0x1d   :  { %292 = vmatpush.bf16.msra.mxu2 %v540_v27 }
  0x1f   :  { %194 = vmatpush.bf16.msra.mxu0 %v523_v16 }
  0x20   :  { %208 = vmatpush.bf16.msra.mxu1 %v531_v17 }
  0x21   :  { %293 = vmatpush.bf16.msra.mxu2 %v539_v28 }
  0x23   :  { %195 = vmatpush.bf16.msra.mxu0 %v522_v18 }
  0x24   :  { %209 = vmatpush.bf16.msra.mxu1 %v530_v19 }
  0x25   :  { %294 = vmatpush.bf16.msra.mxu2 %v538_v29 }
  0x26   :  { %196 = vmatmul.bf16.vlgmr.msra.gmra.mxu0 %v402_v24 }
  0x27   :  { %210 = vmatmul.bf16.vlgmr.msra.gmra.mxu1 %v406_v25 }
  0xa3   :  { %v197_v30 = vpop.f32.mrf.mxu0 }
  0xa4   :  { %v211_v31 = vpop.f32.mrf.mxu1  ;;  %v198_v33 = vadd.f32 %v556_v32, %v197_v30 }
  0xa6   :  { %v212_v35 = vadd.f32 %v211_v31, %v198_v33 }
  0xa8   :  { %v216_v39 = vmax.f32 %v212_v35, 0.0 }
  0xab   :  { %v199_v34 = vpop.f32.mrf.mxu0 }
  0xac   :  { %v200_v36 = vadd.f32 %v556_v32, %v199_v34  ;;  %v213_v37 = vpop.f32.mrf.mxu1 }
  0xae   :  { %v214_v38 = vadd.f32 %v213_v37, %v200_v36 }
  0xb0   :  { %v217_v40 = vmax.f32 %v214_v38, 0.0 }
  0xb2   :  { %v218_v41 = vpack.c.bf16 %v217_v40, %v216_v39 }
  0xb4   :  { %295 = vmatmul.bf16.vlgmr.msra.gmra.mxu2 %v218_v41 }
 0x137   :  { %v296_v46 = vpop.f32.mrf.mxu2 }
 0x138   :  { %v297_v48 = vadd.f32 %v557_v47, %v296_v46 }
 0x13a   :  { %v301_v51 = vmax.f32 %v297_v48, 0.0 }
 0x13f   :  { %v298_v49 = vpop.f32.mrf.mxu2 }
 0x140   :  { %v299_v50 = vadd.f32 %v557_v47, %v298_v49 }
 0x142   :  { %v302_v52 = vmax.f32 %v299_v50, 0.0 }
 0x144   :  { %v303_v53 = vpack.c.bf16 %v302_v52, %v301_v51 }
 0x146   :  { %519 = vmatmul.msk.bf16.vlgmr.msra.gmra.mxu3 %vm340_vm0, %v303_v53 }
 0x1c9   :  { %v353_v55 = vpop.f32.mrf.mxu3 }
 0x1ca   :  { %v354_v56 = vadd.f32 %v558_v54, %v353_v55 }
 0x1cc   :  { %358 = vmax.xlane.f32.xlu0 %v354_v56 }
 0x1d1   :  { %v355_v57 = vpop.f32.mrf.mxu3 }
 0x1d2   :  { %v356_v58 = vadd.f32 %v558_v54, %v355_v57 }
 0x1d4   :  { %360 = vmax.xlane.f32.xlu0 %v356_v58 }
 0x23f   :  { %v359_v59 = vpop.xlane.xlu0 %358 }
 0x240   :  { %v362_v60 = vsub.f32 %v354_v56, %v359_v59 }
 0x242   :  { %v364_v61 = vmul.f32 1.442695, %v362_v60 }
 0x244   :  { %559 = vpow2.f32 %v364_v61 }
 0x247   :  { %v361_v62 = vpop.xlane.xlu0 %360 }
 0x248   :  { %v363_v63 = vsub.f32 %v356_v58, %v361_v62 }
 0x24a   :  { %v560_v0 = vpop.eup %559  ;;  %v366_v1 = vmul.f32 1.442695, %v363_v63 }
 0x24b   :  { %368 = vadd.xlane.f32.xlu1 %v560_v0 }
 0x24c   :  { %561 = vpow2.f32 %v366_v1 }
 0x252   :  { %v562_v2 = vpop.eup %561 }
 0x253   :  { %370 = vadd.xlane.f32.xlu1 %v562_v2 }
 0x2be   :  { %v369_v3 = vpop.xlane.xlu1 %368 }
 0x2bf   :  { %563 = vlog2.f32 %v369_v3 }
 0x2c5   :  { %v564_v4 = vpop.eup %563 }
 0x2c6   :  { %v373_v5 = vmul.f32 0.6931472, %v564_v4  ;;  %v371_v6 = vpop.xlane.xlu1 %370 }
 0x2c7   :  { %565 = vlog2.f32 %v371_v6 }
 0x2c8   :  { %v376_v7 = vsub.f32 %v362_v60, %v373_v5 }
 0x2ca   :  { %378 = vst [vmem:[#allocation5] sm:$0xff] %v376_v7 }
 0x2cd   :  { %v566_v8 = vpop.eup %565 }
 0x2ce   :  { %v375_v9 = vmul.f32 0.6931472, %v566_v8 }
 0x2d0   :  { %v377_v10 = vsub.f32 %v363_v63, %v375_v9 }
 0x2d2   :  { %379 = vst [vmem:[#allocation5 + $0x8] sm:$0xff] %v377_v10 }
 0x2d3   :  { %392 = dma.vmem_to_hbm [thread:$0]  %s385_s5, 256, %s387_s19, [#allocation4], %s623_s20, %s623_s20, %s624_s21  }
 0x2d4   :  { %617 = dma.done.wait [#allocation4], 256  }
 0x2d5   :  { %618 = vsyncadd [#allocation4], 4294967040 }
 0x2d6   :  { %397 = vsyncpa [#allocation3], 1 }
 0x2d7   :  { %398 = vsyncpa [#allocation4], 1 }

</bundles_post_ra>
